<compile_context>
chip_gen: v5e
topology: v5e:2x2
jax: 0.10.0
libtpu: 0.0.40
codegen_flags: <defaults>
</compile_context>

<pallas_src>
import functools

import jax
import jax.numpy as jnp
from jax import lax
from jax.experimental import pallas as pl
from jax.experimental.pallas import tpu as pltpu

_LANES = 128
_SUBLANES = 8
_GROUP = _SUBLANES * _LANES      # 1024-element (8x128) alignment unit
_SUB_ROWS = 512                  # compute sub-chunk: 512 x 128 f32 = 256 KiB temporaries


def _chip_defaults():
    """Return (max_tile_rows, num_shards) per TPU generation; conservative fallback."""
    kind = ""
    try:
        kind = jax.devices()[0].device_kind.lower()
    except Exception:
        pass
    if "v5 lite" in kind or "v5lite" in kind or "v5e" in kind:
        return 2048, 1           # 16 MiB default scoped VMEM, 1 TensorCore
    if "v6" in kind:
        return 4096, 1           # 32 MiB scoped VMEM, 1 TensorCore
    if "v7" in kind or "7x" in kind:
        return 8192, 2           # 32 MiB scoped VMEM (64 physical), 2 TensorCores
    return 2048, 1               # safe everywhere


def _make_kernel(*, tile_rows, sub_rows, steps_per_shard, rows_valid, needs_mask):
    n_sub = tile_rows // sub_rows

    def kernel(x_ref, gt_ref, t_ref, sse_ref, bce_ref):
        s = pl.program_id(0)
        k = pl.program_id(1)

        @pl.when(k == 0)
        def _init():
            sse_ref[...] = jnp.zeros_like(sse_ref)
            bce_ref[...] = jnp.zeros_like(bce_ref)

        # Logical (unclamped) first row of this grid step; used only for masking.
        base_row = (s * steps_per_shard + k) * tile_rows

        def chunk_partials(r0):
            x = x_ref[pl.ds(r0, sub_rows), :].astype(jnp.float32)
            gt = gt_ref[pl.ds(r0, sub_rows), :].astype(jnp.float32)
            t = t_ref[pl.ds(r0, sub_rows), :].astype(jnp.float32)
            if needs_mask:
                rid = base_row + r0 + lax.broadcasted_iota(
                    jnp.int32, (sub_rows, _LANES), 0)
                valid = rid < rows_valid
                # Substitute neutral inputs BEFORE any log so out-of-range rows
                # contribute exactly 0 to both sums (and never produce NaN).
                x = jnp.where(valid, x, 1.0)
                gt = jnp.where(valid, gt, 1.0)
                t = jnp.where(valid, t, 1.0)

            # --- MSE partial: sum of squared errors (VPU only). ---
            diff = x - gt
            sse_p = jnp.sum(
                (diff * diff).reshape(sub_rows // _SUBLANES, _SUBLANES, _LANES), axis=0)

            # --- BCE partial: -(t*log(x) + (1-t)*log(1-x)), logs clamped at -100
            #     (matches PyTorch BCELoss; keeps soft-target semantics). ---
            log_x = jnp.maximum(jnp.log(x), -100.0)
            log_1mx = jnp.maximum(jnp.log(1.0 - x), -100.0)
            bce_elem = -(log_1mx + t * (log_x - log_1mx))
            bce_p = jnp.sum(
                bce_elem.reshape(sub_rows // _SUBLANES, _SUBLANES, _LANES), axis=0)
            return sse_p, bce_p

        def body(c, carry):
            sse_acc, bce_acc = carry
            r0 = pl.multiple_of(c * sub_rows, sub_rows)
            sse_p, bce_p = chunk_partials(r0)
            return sse_acc + sse_p, bce_acc + bce_p

        zero = jnp.zeros((_SUBLANES, _LANES), jnp.float32)
        sse_part, bce_part = lax.fori_loop(0, n_sub, body, (zero, zero), unroll=True)

        sse_ref[...] += sse_part[None]
        bce_ref[...] += bce_part[None]

    return kernel


def joint_loss(x, gt_map, target_map, *, alpha, beta):
    """alpha * MSELoss(size_average=False)(x, gt) + beta * BCELoss(size_average=True)(x, t)."""
    total = x.size
    cap_rows, num_shards = _chip_defaults()

    # Pad (only if needed) to a 1024-element boundary with the neutral value 1.0:
    # (1-1)^2 == 0 for the MSE sum; x=1, t=1 gives exactly 0 for the BCE sum.
    padded_total = ((total + _GROUP - 1) // _GROUP) * _GROUP
    pad = padded_total - total

    def _as_slab(a):
        f = a.reshape(-1)                      # free (metadata only); keep native dtype
        if pad:
            f = jnp.pad(f, (0, pad), constant_values=1)
        return f.reshape(padded_total // _LANES, _LANES)

    xf = _as_slab(x)
    gf = _as_slab(gt_map)
    tf = _as_slab(target_map)

    rows = padded_total // _LANES              # multiple of 8

    if rows <= _SUB_ROWS:
        tile_rows = rows                       # single full-extent block
        sub_rows = rows
    else:
        tile_rows = min(cap_rows, (rows // _SUB_ROWS) * _SUB_ROWS)
        sub_rows = _SUB_ROWS

    total_tiles = pl.cdiv(rows, tile_rows)
    shards = min(num_shards, total_tiles)
    steps_per_shard = pl.cdiv(total_tiles, shards)
    needs_mask = shards * steps_per_shard * tile_rows > rows

    def in_index(s, k):
        blk = s * steps_per_shard + k
        # Clamp so over-shot grid steps re-read the last valid tile (their logical
        # row indices are >= rows, so the in-kernel mask zeroes their contribution).
        return (jnp.minimum(blk, total_tiles - 1), 0)

    in_spec = pl.BlockSpec((tile_rows, _LANES), in_index)
    acc_spec = pl.BlockSpec((1, _SUBLANES, _LANES), lambda s, k: (s, 0, 0))
    acc_shape = jax.ShapeDtypeStruct((shards, _SUBLANES, _LANES), jnp.float32)

    kernel = _make_kernel(
        tile_rows=tile_rows, sub_rows=sub_rows, steps_per_shard=steps_per_shard,
        rows_valid=rows, needs_mask=needs_mask)

    bytes_in = int(sum(int(a.size) * a.dtype.itemsize for a in (xf, gf, tf)))

    sse_out, bce_out = pl.pallas_call(
        kernel,
        out_shape=(acc_shape, acc_shape),
        grid_spec=pltpu.PrefetchScalarGridSpec(
            num_scalar_prefetch=0,
            grid=(shards, steps_per_shard),
            in_specs=[in_spec, in_spec, in_spec],
            out_specs=(acc_spec, acc_spec),
        ),
        compiler_params=pltpu.CompilerParams(
            dimension_semantics=("parallel", "arbitrary")),
        cost_estimate=pl.CostEstimate(
            flops=12 * padded_total,
            transcendentals=2 * padded_total,
            bytes_accessed=bytes_in),
    )(xf, gf, tf)

    # Tiny final cross-lane reductions + combine in plain JAX (linear -> partials add).
    sse = jnp.sum(sse_out)
    bce_mean = jnp.sum(bce_out) / float(total)
    return alpha * sse + beta * bce_mean
    # TODO(synk): original forward calls sys.stdout.flush(); host I/O has no kernel equivalent.


def _reference(x, gt_map, target_map, alpha, beta):
    x32 = x.astype(jnp.float32)
    g32 = gt_map.astype(jnp.float32)
    t32 = target_map.astype(jnp.float32)
    mse = jnp.sum((x32 - g32) ** 2) * alpha
    bce = jnp.mean(
        -(t32 * jnp.maximum(jnp.log(x32), -100.0)
          + (1.0 - t32) * jnp.maximum(jnp.log(1.0 - x32), -100.0))
    ) * beta
    return mse + bce


if __name__ == "__main__":
    key = jax.random.PRNGKey(0)
    alpha, beta = 1.0, 10.0
    loss_fn = jax.jit(functools.partial(joint_loss, alpha=alpha, beta=beta))

    # --- Test 1: spec-consistent dense prediction map (N=2, C=4, H=W=16), f32. ---
    k1, k2, k3 = jax.random.split(key, 3)
    shape = (2, 4, 16, 16)
    x = jax.nn.sigmoid(jax.random.normal(k1, shape, dtype=jnp.float32))
    gt_map = jax.random.uniform(k2, shape, dtype=jnp.float32)
    target_map = (jax.random.uniform(k3, shape) > 0.5).astype(jnp.float32)

    loss = loss_fn(x, gt_map, target_map)
    jax.block_until_ready(loss)
    ref = _reference(x, gt_map, target_map, alpha, beta)
    assert jnp.allclose(loss, ref, rtol=1e-4, atol=1e-4), (loss, ref)

    # --- Test 2: awkward size (not a multiple of 1024) exercising the 128-boundary pad,
    #     boundary tile and in-kernel neutral-value masking. ---
    k4, k5, k6 = jax.random.split(jax.random.PRNGKey(1), 3)
    shape2 = (1, 5, 130, 111)   # 72150 elements
    x2 = jax.nn.sigmoid(jax.random.normal(k4, shape2, dtype=jnp.float32))
    g2 = jax.random.uniform(k5, shape2, dtype=jnp.float32)
    t2 = (jax.random.uniform(k6, shape2) > 0.5).astype(jnp.float32)

    loss2 = loss_fn(x2, g2, t2)
    jax.block_until_ready(loss2)
    ref2 = _reference(x2, g2, t2, alpha, beta)
    assert jnp.allclose(loss2, ref2, rtol=1e-4, atol=1e-4), (loss2, ref2)

    # --- Test 3: native bf16 streaming (no wrapper upcast), same awkward size. ---
    x3 = x2.astype(jnp.bfloat16)
    g3 = g2.astype(jnp.bfloat16)
    t3 = t2.astype(jnp.bfloat16)
    loss3 = loss_fn(x3, g3, t3)
    jax.block_until_ready(loss3)
    ref3 = _reference(x3, g3, t3, alpha, beta)
    assert jnp.allclose(loss3, ref3, rtol=1e-4, atol=1e-4), (loss3, ref3)

    print("KERNEL_OK")
</pallas_src>

<mosaic_0001>
module attributes {stable_mosaic.version = 11 : i64} {
  func.func @kernel(%arg0: i32, %arg1: i32, %arg2: memref<16x128xf32, #tpu.memory_space<vmem>>, %arg3: memref<16x128xf32, #tpu.memory_space<vmem>>, %arg4: memref<16x128xf32, #tpu.memory_space<vmem>>, %arg5: memref<1x8x128xf32, #tpu.memory_space<vmem>>, %arg6: memref<1x8x128xf32, #tpu.memory_space<vmem>>) attributes {dimension_semantics = [#tpu.dimension_semantics<parallel>, #tpu.dimension_semantics<arbitrary>], iteration_bounds = array<i64: 1, 1>, scalar_prefetch = 0 : i64, scratch_operands = 0 : i64, tpu.core_type = #tpu.core_type<tc>, window_params = [{transform_indices = @transform_0, window_bounds = array<i64: 16, 128>}, {transform_indices = @transform_1, window_bounds = array<i64: 16, 128>}, {transform_indices = @transform_2, window_bounds = array<i64: 16, 128>}, {transform_indices = @transform_3, window_bounds = array<i64: 1, 8, 128>}, {transform_indices = @transform_4, window_bounds = array<i64: 1, 8, 128>}]} {
    %c0_i32 = arith.constant 0 : i32
    %0 = arith.cmpi eq, %arg1, %c0_i32 : i32
    %1 = arith.extui %0 : i1 to i32
    %c0_i32_0 = arith.constant 0 : i32
    %2 = arith.cmpi ne, %1, %c0_i32_0 : i32
    scf.if %2 {
      %cst_22 = arith.constant 0.000000e+00 : f32
      %41 = vector.broadcast %cst_22 : f32 to vector<1x8x128xf32>
      %c0_23 = arith.constant 0 : index
      %c0_24 = arith.constant 0 : index
      %c0_25 = arith.constant 0 : index
      %42 = vector.load %arg5[%c0_23, %c0_24, %c0_25] : memref<1x8x128xf32, #tpu.memory_space<vmem>>, vector<1x8x128xf32>
      tpu.vector_store %arg5[%c0_23, %c0_24, %c0_25], %41 {strides = array<i32>} : memref<1x8x128xf32, #tpu.memory_space<vmem>>, vector<1x8x128xf32>,
      %cst_26 = arith.constant 0.000000e+00 : f32
      %43 = vector.broadcast %cst_26 : f32 to vector<1x8x128xf32>
      %c0_27 = arith.constant 0 : index
      %c0_28 = arith.constant 0 : index
      %c0_29 = arith.constant 0 : index
      %44 = vector.load %arg6[%c0_27, %c0_28, %c0_29] : memref<1x8x128xf32, #tpu.memory_space<vmem>>, vector<1x8x128xf32>
      tpu.vector_store %arg6[%c0_27, %c0_28, %c0_29], %43 {strides = array<i32>} : memref<1x8x128xf32, #tpu.memory_space<vmem>>, vector<1x8x128xf32>,
    } else {
    }
    %cst = arith.constant 0.000000e+00 : f32
    %3 = vector.broadcast %cst : f32 to vector<8x128xf32>
    %c0_i32_1 = arith.constant 0 : i32
    %c16_i32 = arith.constant 16 : i32
    %4 = arith.muli %c0_i32_1, %c16_i32 : i32
    %5 = tpu.assume_multiple %4, 16 : i32
    %6 = arith.index_cast %5 : i32 to index
    %c0 = arith.constant 0 : index
    %7 = vector.load %arg2[%6, %c0] : memref<16x128xf32, #tpu.memory_space<vmem>>, vector<16x128xf32>
    %8 = arith.index_cast %5 : i32 to index
    %c0_2 = arith.constant 0 : index
    %9 = vector.load %arg3[%8, %c0_2] : memref<16x128xf32, #tpu.memory_space<vmem>>, vector<16x128xf32>
    %10 = arith.index_cast %5 : i32 to index
    %c0_3 = arith.constant 0 : index
    %11 = vector.load %arg4[%10, %c0_3] : memref<16x128xf32, #tpu.memory_space<vmem>>, vector<16x128xf32>
    %12 = arith.subf %7, %9 : vector<16x128xf32>
    %13 = arith.mulf %12, %12 : vector<16x128xf32>
    %14 = vector.shape_cast %13 : vector<16x128xf32> to vector<2x8x128xf32>
    %cst_4 = arith.constant dense<0.000000e+00> : vector<8x128xf32>
    %15 = vector.multi_reduction <add>, %14, %cst_4 [0] : vector<2x8x128xf32> to vector<8x128xf32>
    %16 = math.log %7 : vector<16x128xf32>
    %cst_5 = arith.constant -1.000000e+02 : f32
    %17 = vector.broadcast %cst_5 : f32 to vector<16x128xf32>
    %18 = arith.maximumf %16, %17 : vector<16x128xf32>
    %cst_6 = arith.constant 1.000000e+00 : f32
    %19 = vector.broadcast %cst_6 : f32 to vector<16x128xf32>
    %20 = arith.subf %19, %7 : vector<16x128xf32>
    %21 = math.log %20 : vector<16x128xf32>
    %cst_7 = arith.constant -1.000000e+02 : f32
    %22 = vector.broadcast %cst_7 : f32 to vector<16x128xf32>
    %23 = arith.maximumf %21, %22 : vector<16x128xf32>
    %24 = arith.subf %18, %23 : vector<16x128xf32>
    %25 = arith.mulf %11, %24 : vector<16x128xf32>
    %26 = arith.addf %23, %25 : vector<16x128xf32>
    %cst_8 = arith.constant 0.000000e+00 : f32
    %27 = vector.broadcast %cst_8 : f32 to vector<16x128xf32>
    %28 = arith.subf %27, %26 : vector<16x128xf32>
    %29 = vector.shape_cast %28 : vector<16x128xf32> to vector<2x8x128xf32>
    %cst_9 = arith.constant dense<0.000000e+00> : vector<8x128xf32>
    %30 = vector.multi_reduction <add>, %29, %cst_9 [0] : vector<2x8x128xf32> to vector<8x128xf32>
    %31 = arith.addf %3, %15 : vector<8x128xf32>
    %32 = arith.addf %3, %30 : vector<8x128xf32>
    %c1_i32 = arith.constant 1 : i32
    %c0_10 = arith.constant 0 : index
    %c0_11 = arith.constant 0 : index
    %c0_12 = arith.constant 0 : index
    %33 = vector.load %arg5[%c0_10, %c0_11, %c0_12] : memref<1x8x128xf32, #tpu.memory_space<vmem>>, vector<1x8x128xf32>
    %34 = vector.shape_cast %31 : vector<8x128xf32> to vector<1x8x128xf32>
    %35 = arith.addf %33, %34 : vector<1x8x128xf32>
    %c0_13 = arith.constant 0 : index
    %c0_14 = arith.constant 0 : index
    %c0_15 = arith.constant 0 : index
    %36 = vector.load %arg5[%c0_13, %c0_14, %c0_15] : memref<1x8x128xf32, #tpu.memory_space<vmem>>, vector<1x8x128xf32>
    tpu.vector_store %arg5[%c0_13, %c0_14, %c0_15], %35 {strides = array<i32>} : memref<1x8x128xf32, #tpu.memory_space<vmem>>, vector<1x8x128xf32>,
    %c0_16 = arith.constant 0 : index
    %c0_17 = arith.constant 0 : index
    %c0_18 = arith.constant 0 : index
    %37 = vector.load %arg6[%c0_16, %c0_17, %c0_18] : memref<1x8x128xf32, #tpu.memory_space<vmem>>, vector<1x8x128xf32>
    %38 = vector.shape_cast %32 : vector<8x128xf32> to vector<1x8x128xf32>
    %39 = arith.addf %37, %38 : vector<1x8x128xf32>
    %c0_19 = arith.constant 0 : index
    %c0_20 = arith.constant 0 : index
    %c0_21 = arith.constant 0 : index
    %40 = vector.load %arg6[%c0_19, %c0_20, %c0_21] : memref<1x8x128xf32, #tpu.memory_space<vmem>>, vector<1x8x128xf32>
    tpu.vector_store %arg6[%c0_19, %c0_20, %c0_21], %39 {strides = array<i32>} : memref<1x8x128xf32, #tpu.memory_space<vmem>>, vector<1x8x128xf32>,
    return
  }
  func.func @transform_0(%arg0: i32, %arg1: i32) -> (i32, i32) {
    %c1_i32 = arith.constant 1 : i32
    %0 = arith.muli %arg0, %c1_i32 : i32
    %1 = arith.addi %0, %arg1 : i32
    %c0_i32 = arith.constant 0 : i32
    %2 = arith.minsi %1, %c0_i32 : i32
    %c0_i32_0 = arith.constant 0 : i32
    %c0_i32_1 = arith.constant 0 : i32
    return %2, %c0_i32_0 : i32, i32
  }
  func.func @transform_1(%arg0: i32, %arg1: i32) -> (i32, i32) {
    %c1_i32 = arith.constant 1 : i32
    %0 = arith.muli %arg0, %c1_i32 : i32
    %1 = arith.addi %0, %arg1 : i32
    %c0_i32 = arith.constant 0 : i32
    %2 = arith.minsi %1, %c0_i32 : i32
    %c0_i32_0 = arith.constant 0 : i32
    %c0_i32_1 = arith.constant 0 : i32
    return %2, %c0_i32_0 : i32, i32
  }
  func.func @transform_2(%arg0: i32, %arg1: i32) -> (i32, i32) {
    %c1_i32 = arith.constant 1 : i32
    %0 = arith.muli %arg0, %c1_i32 : i32
    %1 = arith.addi %0, %arg1 : i32
    %c0_i32 = arith.constant 0 : i32
    %2 = arith.minsi %1, %c0_i32 : i32
    %c0_i32_0 = arith.constant 0 : i32
    %c0_i32_1 = arith.constant 0 : i32
    return %2, %c0_i32_0 : i32, i32
  }
  func.func @transform_3(%arg0: i32, %arg1: i32) -> (i32, i32, i32) {
    %c0_i32 = arith.constant 0 : i32
    %c0_i32_0 = arith.constant 0 : i32
    %c0_i32_1 = arith.constant 0 : i32
    return %arg0, %c0_i32, %c0_i32_0 : i32, i32, i32
  }
  func.func @transform_4(%arg0: i32, %arg1: i32) -> (i32, i32, i32) {
    %c0_i32 = arith.constant 0 : i32
    %c0_i32_0 = arith.constant 0 : i32
    %c0_i32_1 = arith.constant 0 : i32
    return %arg0, %c0_i32, %c0_i32_0 : i32, i32, i32
  }
}

</mosaic_0001>

<bundles_post_ra>
// kernel: joint_loss.1
= control target key start
LH: loop header
LB: loop body
LE: loop exit
PB: predicated region body
PF: predicated region fallthrough
CT: control target
= control target key end

     0   :  { %s244_s0 = inlined_call_operand.vmem [shape: f32[16,128], index: 0, kind: input, shape index: {}]   ;;  %s245_s1 = inlined_call_operand.vmem [shape: f32[16,128], index: 1, kind: input, shape index: {}]   ;;  %s246_s3 = inlined_call_operand.vmem [shape: f32[1,8,128], index: 3, kind: output, shape index: {0}]   ;;  %s247_s2 = inlined_call_operand.vmem [shape: f32[16,128], index: 2, kind: input, shape index: {}]   ;;  %s248_s4 = inlined_call_operand.vmem [shape: f32[1,8,128], index: 4, kind: output, shape index: {1}]  }
   0x1   :  { %v118_v0 = vld [vmem:[%s244_s0] sm:$0xff]  ;;  %v119_v1 = vld [vmem:[%s244_s0 + $0x8] sm:$0xff] }
   0x2   :  { %v120_v2 = vld [vmem:[%s245_s1] sm:$0xff]  ;;  %v121_v3 = vld [vmem:[%s245_s1 + $0x8] sm:$0xff]  ;;  %187 = vlog2.f32 %v118_v0  ;;  %v135_v5 = vsub.f32 1.0, %v118_v0  ;;  %v136_v6 = vsub.f32 1.0, %v119_v1 }
   0x3   :  { %v124_v4 = vsub.f32 %v118_v0, %v120_v2  ;;  %v125_v7 = vsub.f32 %v119_v1, %v121_v3  ;;  %189 = vlog2.f32 %v119_v1  ;;  %v122_v22 = vld [vmem:[%s247_s2] sm:$0xff]  ;;  %v123_v24 = vld [vmem:[%s247_s2 + $0x8] sm:$0xff] }
   0x4   :  { %191 = vlog2.f32 %v135_v5 }
   0x5   :  { %v126_v8 = vmul.f32 %v124_v4, %v124_v4  ;;  %v127_v9 = vmul.f32 %v125_v7, %v125_v7  ;;  %193 = vlog2.f32 %v136_v6 }
   0x7   :  { %v128_v10 = vadd.f32 %v127_v9, %v126_v8 }
   0x8   :  { %v188_v11 = vpop.eup %187 }
   0x9   :  { %v190_v12 = vpop.eup %189  ;;  %v130_v13 = vmul.f32 0.6931472, %v188_v11  ;;  %156 = vst [vmem:[%s246_s3] sm:$0xff] %v128_v10 }
   0xa   :  { %v192_v14 = vpop.eup %191  ;;  %v132_v15 = vmul.f32 0.6931472, %v190_v12 }
   0xb   :  { %v194_v16 = vpop.eup %193  ;;  %v133_v17 = vmax.f32 %v130_v13, -100.0  ;;  %v138_v18 = vmul.f32 0.6931472, %v192_v14 }
   0xc   :  { %v134_v19 = vmax.f32 %v132_v15, -100.0  ;;  %v140_v20 = vmul.f32 0.6931472, %v194_v16 }
   0xd   :  { %v141_v21 = vmax.f32 %v138_v18, -100.0 }
   0xe   :  { %v142_v23 = vmax.f32 %v140_v20, -100.0 }
   0xf   :  { %v143_v25 = vsub.f32 %v133_v17, %v141_v21 }
  0x10   :  { %v144_v26 = vsub.f32 %v134_v19, %v142_v23 }
  0x11   :  { %v145_v27 = vmul.f32 %v143_v25, %v122_v22 }
  0x12   :  { %v146_v28 = vmul.f32 %v144_v26, %v123_v24 }
  0x13   :  { %v147_v29 = vadd.f32 %v145_v27, %v141_v21 }
  0x14   :  { %v148_v30 = vadd.f32 %v146_v28, %v142_v23 }
  0x15   :  { %v149_v31 = vsub.f32 0.0, %v147_v29 }
  0x16   :  { %v150_v32 = vsub.f32 0.0, %v148_v30 }
  0x18   :  { %v151_v33 = vadd.f32 %v150_v32, %v149_v31 }
  0x1a   :  { %159 = vst [vmem:[%s248_s4] sm:$0xff] %v151_v33 }

</bundles_post_ra>
